<compile_context>
chip_gen: v7x
topology: tpu7x:2x2x1
jax: 0.10.0
libtpu: 0.0.40
codegen_flags: <defaults>
</compile_context>

<pallas_src>
import functools

import jax
import jax.numpy as jnp
import numpy as np
from jax.experimental import pallas as pl
from jax.experimental.pallas import tpu as pltpu


# ---------------------------------------------------------------------------
# Kernel
# ---------------------------------------------------------------------------
def attention_kernel(hproj_ref, enc_ref, we_ref, v_ref, out_ref, *,
                     s_chunk, eltwise_bf16):
    # hproj_ref : (tb, H)    f32   hidden @ W_h + bias (precomputed in XLA)
    # enc_ref   : (tb, S, H) bf16  batch-first encoder block (full S per block)
    # we_ref    : (H, H)     bf16  encoder projection, pre-transposed for x @ W
    # v_ref     : (1, H)     f32   score vector
    # out_ref   : (tb, S)    f32   softmax over S (batch-major / lane-dense)
    tb, S, H = enc_ref.shape
    h_proj = hproj_ref[...]                                   # (tb, H) f32
    w_e = we_ref[...]                                         # (H, H) bf16
    v_row = v_ref[...]                                        # (1, H) f32

    def score_chunk(start, length):
        # Encoder chunk: (tb, length, H) bf16; collapse rows for one MXU pass.
        enc_c = enc_ref[:, pl.ds(start, length), :]
        if length % 16 == 0:
            # chunk is sublane-aligned for bf16 -> layout-free collapse
            enc2d = enc_c.reshape(tb * length, H)
        else:
            # tiny / ragged tail only: relayout via f32 (cheap at these sizes)
            enc2d = enc_c.astype(jnp.float32).reshape(tb * length, H).astype(jnp.bfloat16)
        e_proj = jnp.dot(enc2d, w_e, preferred_element_type=jnp.float32)
        e_proj = e_proj.reshape(tb, length, H)                # f32
        pre = e_proj + h_proj[:, None, :]                     # f32 broadcast-add
        if eltwise_bf16:                                      # v6e/v7x: bf16 EUP/VPU
            energy = jnp.tanh(pre.astype(jnp.bfloat16))
        else:                                                 # v5e: f32 elementwise only
            energy = jnp.tanh(pre)
        # v-projection: VPU multiply (promotes to f32) + lane reduction, no N=1 matmul.
        scores = jnp.sum(energy * v_row, axis=-1)             # (tb, length) f32
        out_ref[:, pl.ds(start, length)] = scores

    n_full = S // s_chunk
    rem = S - n_full * s_chunk
    if n_full == 1:
        score_chunk(0, s_chunk)
    elif n_full > 1:
        @pl.loop(0, n_full)
        def _(c):
            score_chunk(pl.multiple_of(c * s_chunk, s_chunk), s_chunk)
    if rem:
        score_chunk(n_full * s_chunk, rem)

    # Softmax over src_len (S) — lane-dense, whole row is resident in the out block.
    scores_all = out_ref[...]                                 # (tb, S) f32
    m = jnp.max(scores_all, axis=-1, keepdims=True)
    e = jnp.exp(scores_all - m)
    denom = jnp.sum(e, axis=-1, keepdims=True)
    out_ref[...] = e * pl.reciprocal(denom, approx=True)


# ---------------------------------------------------------------------------
# Tiling / generation-aware configuration
# ---------------------------------------------------------------------------
def _device_config():
    """(eltwise_bf16, vmem_limit_bytes, enc_budget_bytes) chosen per TPU generation."""
    try:
        kind = jax.devices()[0].device_kind.lower()
    except Exception:
        kind = ""
    is_v5 = "v5" in kind
    is_v6 = "v6" in kind
    is_v7 = ("v7" in kind) or ("7x" in kind)
    eltwise_bf16 = is_v6 or is_v7            # bf16 VPU/EUP only on v6e / v7x
    if is_v7:                                # 64 MiB physical VMEM -> stay conservative
        return eltwise_bf16, 40 * 1024 * 1024, 2 << 20
    if is_v6 or is_v5:                       # 128 MiB physical VMEM -> bigger tiles
        return eltwise_bf16, 64 * 1024 * 1024, 4 << 20
    return False, 32 * 1024 * 1024, 2 << 20  # unknown chip: conservative, f32 elementwise


def _pick_batch_tile(b_pad, s, h, *, budget_bytes, min_blocks=2):
    """Largest multiple-of-8 divisor of the padded batch whose bf16 (tb, S, H) encoder
    block fits the per-buffer budget; capped so the grid has >= min_blocks blocks when
    the batch allows it (so dimension_semantics="parallel" can use both v7x cores)."""
    cap = budget_bytes // max(1, s * h * 2)
    cap = min(max(8, cap - cap % 8), b_pad)
    if b_pad >= 8 * min_blocks:
        half = b_pad // min_blocks
        cap = min(cap, max(8, half - half % 8))
    tb = 8
    for t in range(8, cap + 1, 8):
        if b_pad % t == 0:
            tb = t
    return tb


def _pick_s_chunk(s, tb, h, *, budget_bytes):
    """Rows of S processed per inner step; bounds the f32 energy temporaries
    (~2 copies of (tb, chunk, H) f32) to ~budget_bytes. Multiple of 16 so the
    bf16 (tb, chunk, H) -> (tb*chunk, H) collapse stays layout-free."""
    cap = budget_bytes // max(1, tb * h * 4 * 2)
    if cap >= s:
        return s
    return min(s, max(16, cap - cap % 16))


def _resident_spec(shape, index_map):
    """BlockSpec for grid-invariant operands: request single buffering (no point
    double-buffering something whose block index never changes)."""
    try:
        return pl.BlockSpec(shape, index_map, pipeline_mode=pl.Buffered(1))
    except TypeError:  # pipeline_mode not supported in this jax version
        return pl.BlockSpec(shape, index_map)


# ---------------------------------------------------------------------------
# Parameter prep (one-time, off the hot path)
# ---------------------------------------------------------------------------
def prepare_attention_params(w_attn, b_attn, w_v):
    """w_attn: (H, 2H), b_attn: (H,), w_v: (1, H) -> (W_h_f32, W_e_bf16, bias, v)."""
    H = b_attn.shape[0]
    w_h = jnp.asarray(w_attn[:, :H].T, dtype=jnp.float32)    # (H, H) — hoisted proj, f32
    w_e = jnp.asarray(w_attn[:, H:].T, dtype=jnp.bfloat16)   # (H, H) — MXU operand
    bias = jnp.asarray(b_attn, dtype=jnp.float32).reshape(1, H)
    v = jnp.asarray(w_v, dtype=jnp.float32).reshape(1, H)
    return w_h, w_e, bias, v


# ---------------------------------------------------------------------------
# Forward wrapper
# ---------------------------------------------------------------------------
@functools.partial(jax.jit, static_argnames=("eltwise_bf16", "enc_budget", "vmem_limit"))
def _attention_forward(hidden, encoder_outputs, w_h, w_e, bias, v,
                       eltwise_bf16, enc_budget, vmem_limit):
    S, B, H = encoder_outputs.shape
    hid = jnp.reshape(hidden, (B, H)).astype(jnp.float32)

    # Hoisted hidden projection (+ bias): tiny (B,H)x(H,H) matmul done once in XLA.
    h_proj = hid @ w_h + bias                                            # (B, H) f32

    # Batch-first encoder feed: each grid block is one contiguous (tb, S, H) DMA.
    enc = jnp.transpose(encoder_outputs, (1, 0, 2)).astype(jnp.bfloat16)  # (B, S, H)

    # Pad batch to a sublane multiple so blocks are always aligned (no escape hatches).
    B_pad = -(-B // 8) * 8
    if B_pad != B:
        enc = jnp.pad(enc, ((0, B_pad - B), (0, 0), (0, 0)))
        h_proj = jnp.pad(h_proj, ((0, B_pad - B), (0, 0)))

    tb = _pick_batch_tile(B_pad, S, H, budget_bytes=enc_budget)
    s_chunk = _pick_s_chunk(S, tb, H, budget_bytes=enc_budget)
    grid = (B_pad // tb,)

    kernel = functools.partial(attention_kernel, s_chunk=s_chunk,
                               eltwise_bf16=eltwise_bf16)

    cost = pl.CostEstimate(
        flops=2 * S * B_pad * H * H + 8 * S * B_pad * H,
        transcendentals=S * B_pad * H + S * B_pad,
        bytes_accessed=S * B_pad * H * 2 + B_pad * H * 4 + 2 * H * H
                       + 4 * H + S * B_pad * 4,
    )

    out_bs = pl.pallas_call(
        kernel,
        out_shape=jax.ShapeDtypeStruct((B_pad, S), jnp.float32),
        grid_spec=pltpu.PrefetchScalarGridSpec(
            num_scalar_prefetch=0,
            grid=grid,
            in_specs=[
                pl.BlockSpec((tb, H), lambda i: (i, 0)),          # h_proj block
                pl.BlockSpec((tb, S, H), lambda i: (i, 0, 0)),    # encoder block (full S)
                _resident_spec((H, H), lambda i: (0, 0)),         # W_e, single-buffered
                _resident_spec((1, H), lambda i: (0, 0)),         # v row, single-buffered
            ],
            out_specs=pl.BlockSpec((tb, S), lambda i: (i, 0)),
        ),
        compiler_params=pltpu.CompilerParams(
            dimension_semantics=("parallel",),   # batch blocks across TCs on v7x
            vmem_limit_bytes=vmem_limit,
        ),
        cost_estimate=cost,
    )(h_proj, enc, w_e, v)

    # Strip batch padding; tiny (B, S) -> (S, B) relayout done by XLA outside.
    return out_bs[:B].T


def attention_forward(hidden, encoder_outputs, w_h, w_e, bias, v):
    """hidden: (B, H) or (1, B, H); encoder_outputs: (S, B, H). Returns (S, B)."""
    eltwise_bf16, vmem_limit, enc_budget = _device_config()
    return _attention_forward(hidden, encoder_outputs, w_h, w_e, bias, v,
                              eltwise_bf16=eltwise_bf16,
                              enc_budget=enc_budget, vmem_limit=vmem_limit)


# ---------------------------------------------------------------------------
# Pure-JAX reference (mirrors the PyTorch module exactly, in f32)
# ---------------------------------------------------------------------------
def attention_reference(hidden, encoder_outputs, w_attn, b_attn, w_v):
    S, B, H = encoder_outputs.shape
    hid = jnp.broadcast_to(jnp.reshape(hidden, (1, B, H)), (S, B, H))
    cat = jnp.concatenate([hid, encoder_outputs], axis=2)               # (S, B, 2H)
    energy = jnp.tanh(jnp.einsum('sbk,hk->sbh', cat, w_attn) + b_attn)
    attn = jnp.einsum('sbh,oh->sbo', energy, w_v)[..., 0]               # (S, B)
    return jax.nn.softmax(attn, axis=0)


if __name__ == "__main__":
    S, B, H = 8, 2, 32
    key = jax.random.PRNGKey(0)
    k1, k2, k3, k4, k5 = jax.random.split(key, 5)

    # Deterministic "parameters" (shapes follow nn.Linear in the module).
    bound_attn = 1.0 / np.sqrt(2 * H)
    w_attn = jax.random.uniform(k1, (H, 2 * H), jnp.float32, -bound_attn, bound_attn)
    b_attn = jax.random.uniform(k2, (H,), jnp.float32, -bound_attn, bound_attn)
    bound_v = 1.0 / np.sqrt(H)
    w_v = jax.random.uniform(k3, (1, H), jnp.float32, -bound_v, bound_v)

    hidden = jax.random.normal(k4, (B, H), jnp.float32)
    encoder_outputs = jax.random.normal(k5, (S, B, H), jnp.float32)

    params = prepare_attention_params(w_attn, b_attn, w_v)   # hoisted one-time prep
    out = attention_forward(hidden, encoder_outputs, *params)
    out = jax.block_until_ready(out)

    ref = attention_reference(hidden, encoder_outputs, w_attn, b_attn, w_v)
    # bf16 MXU operands (+ bf16 tanh on v6e/v7x) + approx reciprocal -> loosened tol;
    # all reductions and the softmax itself stay f32.
    np.testing.assert_allclose(np.asarray(out), np.asarray(ref), rtol=2e-2, atol=2e-2)
    assert out.shape == (S, B)

    print("KERNEL_OK")
</pallas_src>

<mosaic_0001>
module attributes {stable_mosaic.version = 11 : i64} {
  func.func @attention_kernel(%arg0: i32, %arg1: memref<8x32xf32, #tpu.memory_space<vmem>>, %arg2: memref<8x8x32xbf16, #tpu.memory_space<vmem>>, %arg3: memref<32x32xbf16, #tpu.memory_space<vmem>>, %arg4: memref<1x32xf32, #tpu.memory_space<vmem>>, %arg5: memref<8x8xf32, #tpu.memory_space<vmem>>) attributes {dimension_semantics = [#tpu.dimension_semantics<parallel>], iteration_bounds = array<i64: 1>, scalar_prefetch = 0 : i64, scratch_operands = 0 : i64, tpu.core_type = #tpu.core_type<tc>, window_params = [{transform_indices = @transform_0, window_bounds = array<i64: 8, 32>}, {transform_indices = @transform_1, window_bounds = array<i64: 8, 8, 32>}, {pipeline_mode = #tpu.pipeline_mode<synchronous>, transform_indices = @transform_2, window_bounds = array<i64: 32, 32>}, {pipeline_mode = #tpu.pipeline_mode<synchronous>, transform_indices = @transform_3, window_bounds = array<i64: 1, 32>}, {transform_indices = @transform_4, window_bounds = array<i64: 8, 8>}]} {
    %c0 = arith.constant 0 : index
    %c0_0 = arith.constant 0 : index
    %0 = vector.load %arg1[%c0, %c0_0] : memref<8x32xf32, #tpu.memory_space<vmem>>, vector<8x32xf32>
    %c0_1 = arith.constant 0 : index
    %c0_2 = arith.constant 0 : index
    %1 = vector.load %arg3[%c0_1, %c0_2] : memref<32x32xbf16, #tpu.memory_space<vmem>>, vector<32x32xbf16>
    %c0_3 = arith.constant 0 : index
    %c0_4 = arith.constant 0 : index
    %2 = vector.load %arg4[%c0_3, %c0_4] : memref<1x32xf32, #tpu.memory_space<vmem>>, vector<1x32xf32>
    %c0_5 = arith.constant 0 : index
    %c0_6 = arith.constant 0 : index
    %c0_7 = arith.constant 0 : index
    %3 = vector.load %arg2[%c0_5, %c0_6, %c0_7] : memref<8x8x32xbf16, #tpu.memory_space<vmem>>, vector<8x8x32xbf16>
    %4 = arith.extf %3 : vector<8x8x32xbf16> to vector<8x8x32xf32>
    %5 = vector.shape_cast %4 : vector<8x8x32xf32> to vector<64x32xf32>
    %6 = arith.truncf %5 : vector<64x32xf32> to vector<64x32xbf16>
    %cst = arith.constant dense<0.000000e+00> : vector<64x32xf32>
    %7 = tpu.matmul %6, %1, %cst {dimension_numbers = #tpu.dot_dimension_numbers<[1], [0], [0], [1], [0, 0, 1, 1], [], []>} : vector<64x32xbf16>, vector<32x32xbf16>, vector<64x32xf32> -> vector<64x32xf32>
    %8 = vector.shape_cast %7 : vector<64x32xf32> to vector<8x8x32xf32>
    %9 = vector.shape_cast %0 : vector<8x32xf32> to vector<8x1x32xf32>
    %10 = vector.broadcast %9 : vector<8x1x32xf32> to vector<8x8x32xf32>
    %11 = arith.addf %8, %10 : vector<8x8x32xf32>
    %12 = math.tanh %11 : vector<8x8x32xf32>
    %13 = vector.shape_cast %2 : vector<1x32xf32> to vector<1x1x32xf32>
    %14 = vector.broadcast %13 : vector<1x1x32xf32> to vector<8x8x32xf32>
    %15 = arith.mulf %12, %14 : vector<8x8x32xf32>
    %cst_8 = arith.constant dense<0.000000e+00> : vector<8x8xf32>
    %16 = vector.multi_reduction <add>, %15, %cst_8 [2] : vector<8x8x32xf32> to vector<8x8xf32>
    %c0_9 = arith.constant 0 : index
    %c0_10 = arith.constant 0 : index
    %17 = vector.load %arg5[%c0_9, %c0_10] : memref<8x8xf32, #tpu.memory_space<vmem>>, vector<8x8xf32>
    tpu.vector_store %arg5[%c0_9, %c0_10], %16 {strides = array<i32>} : memref<8x8xf32, #tpu.memory_space<vmem>>, vector<8x8xf32>,
    %c0_11 = arith.constant 0 : index
    %c0_12 = arith.constant 0 : index
    %18 = vector.load %arg5[%c0_11, %c0_12] : memref<8x8xf32, #tpu.memory_space<vmem>>, vector<8x8xf32>
    %cst_13 = arith.constant dense<0xFF800000> : vector<8xf32>
    %19 = vector.multi_reduction <maximumf>, %18, %cst_13 [1] : vector<8x8xf32> to vector<8xf32>
    %20 = vector.shape_cast %19 : vector<8xf32> to vector<8x1xf32>
    %21 = vector.broadcast %20 : vector<8x1xf32> to vector<8x8xf32>
    %22 = arith.subf %18, %21 : vector<8x8xf32>
    %23 = math.exp %22 : vector<8x8xf32>
    %cst_14 = arith.constant dense<0.000000e+00> : vector<8xf32>
    %24 = vector.multi_reduction <add>, %23, %cst_14 [1] : vector<8x8xf32> to vector<8xf32>
    %25 = vector.shape_cast %24 : vector<8xf32> to vector<8x1xf32>
    %26 = tpu.reciprocal %25 {approx = true} : vector<8x1xf32> -> vector<8x1xf32>
    %27 = vector.broadcast %26 : vector<8x1xf32> to vector<8x8xf32>
    %28 = arith.mulf %23, %27 : vector<8x8xf32>
    %c0_15 = arith.constant 0 : index
    %c0_16 = arith.constant 0 : index
    %29 = vector.load %arg5[%c0_15, %c0_16] : memref<8x8xf32, #tpu.memory_space<vmem>>, vector<8x8xf32>
    tpu.vector_store %arg5[%c0_15, %c0_16], %28 {strides = array<i32>} : memref<8x8xf32, #tpu.memory_space<vmem>>, vector<8x8xf32>,
    return
  }
  func.func @transform_0(%arg0: i32) -> (i32, i32) {
    %c0_i32 = arith.constant 0 : i32
    %c0_i32_0 = arith.constant 0 : i32
    return %arg0, %c0_i32 : i32, i32
  }
  func.func @transform_1(%arg0: i32) -> (i32, i32, i32) {
    %c0_i32 = arith.constant 0 : i32
    %c0_i32_0 = arith.constant 0 : i32
    %c0_i32_1 = arith.constant 0 : i32
    return %arg0, %c0_i32, %c0_i32_0 : i32, i32, i32
  }
  func.func @transform_2(%arg0: i32) -> (i32, i32) {
    %c0_i32 = arith.constant 0 : i32
    %c0_i32_0 = arith.constant 0 : i32
    %c0_i32_1 = arith.constant 0 : i32
    return %c0_i32, %c0_i32_0 : i32, i32
  }
  func.func @transform_3(%arg0: i32) -> (i32, i32) {
    %c0_i32 = arith.constant 0 : i32
    %c0_i32_0 = arith.constant 0 : i32
    %c0_i32_1 = arith.constant 0 : i32
    return %c0_i32, %c0_i32_0 : i32, i32
  }
  func.func @transform_4(%arg0: i32) -> (i32, i32) {
    %c0_i32 = arith.constant 0 : i32
    %c0_i32_0 = arith.constant 0 : i32
    return %arg0, %c0_i32 : i32, i32
  }
}

</mosaic_0001>

<bundles_post_ra>
// kernel: _attention_forward.1
= control target key start
LH: loop header
LB: loop body
LE: loop exit
PB: predicated region body
PF: predicated region fallthrough
CT: control target
= control target key end

     0   :  { %vm56_vm0 = vcmask 261120   ;;  %v139_v6 = vlaneseq  ;;  %v415_v10 = vmov 1966171168   ;;  %vm320_vm1 = vcmask 1041409   ;;  %s500_s2 = inlined_call_operand.vmem [shape: bf16[32,32], index: 2, kind: input, shape index: {}]   ;;  %s501_s1 = inlined_call_operand.vmem [shape: bf16[8,8,32], index: 1, kind: input, shape index: {}]   ;;  %s502_s0 = inlined_call_operand.vmem [shape: f32[8,32], index: 0, kind: input, shape index: {}]   ;;  %s503_s3 = inlined_call_operand.vmem [shape: f32[1,32], index: 3, kind: input, shape index: {}]   ;;  %s504_s4 = inlined_call_operand.vmem [shape: f32[8,8], index: 4, kind: output, shape index: {}]  }
   0x1   :  { %v388_v0 = vld [vmem:[%s500_s2] sm:$0xff]   ;;  %v389_v1 = vld [vmem:[%s500_s2 + $0x8] sm:$0xff]   ;;  %v392_v3 = vld [vmem:[%s501_s1 + $0x10] sm:$0xff]   ;;  %v137_v11 = vunpack.c.l.s4 %v415_v10  ;;  %vm322_vm2 = vcmask 1042434   ;;  %vm324_vm3 = vcmask 1043459   ;;  %vm326_vm4 = vcmask 1044484  }
   0x2   :  { %371 = vmatprep.subr.bf16.mxu0 %v388_v0  ;;  %383 = vmatprep.subr.bf16.mxu1 %v388_v0  ;;  %v390_v2 = vld [vmem:[%s501_s1] sm:$0xff]   ;;  %v391_v4 = vld [vmem:[%s501_s1 + $0x8] sm:$0xff]   ;;  %v393_v5 = vld [vmem:[%s501_s1 + $0x18] sm:$0xff]   ;;  %v287_v7 = vand.u32 127, %v139_v6  ;;  %v140_v8 = vshrl.u32 %v139_v6, 7  ;;  %vm328_vm5 = vcmask 1045509  }
   0x3   :  { %372 = vmatpush3.bf16.msra.mxu0 %v388_v0  ;;  %385 = vmatpush3.bf16.msra.mxu1 %v388_v0  ;;  %v138_v12 = vunpack.c.0.s8 %v137_v11  ;;  %v18_v14 = vld [vmem:[%s502_s0] sm:$0xff]  ;;  %vm330_vm6 = vcmask 1046534   ;;  %vm332_vm7 = vcmask 1047559   ;;  %vm335_vm8 = vcmask 64512  }
   0x4   :  { %373 = vmatprep.subr.bf16.mxu0 %v389_v1  ;;  %375 = vmatprep.mubr.msk.bf16.mxu0 %vm56_vm0, %v390_v2  ;;  %v463_v9 = vsub.s32 %v287_v7, %v140_v8  ;;  %v135_v16 = vcombine.high %v18_v14, %v18_v14  ;;  %v186_v23 = vsub.s32 0, %v140_v8  ;;  %v364_v53 = vld [vmem:[%s503_s3] ss:$0 sm:$0xff] }
   0x5   :  { %384 = vmatprep.subr.bf16.mxu1 %v389_v1  ;;  %379 = vmatprep.mubr.msk.bf16.mxu1 %vm56_vm0, %v392_v3  ;;  %v141_v13 = vsub.s32 %v138_v12, %v140_v8 }
   0x7   :  { %374 = vmatpush3.bf16.msra.mxu0 %v389_v1  ;;  %386 = vmatpush3.bf16.msra.mxu1 %v389_v1  ;;  %v142_v15 = vrot.slane %v18_v14, %v141_v13  ;;  %v149_v18 = vrot.slane %v135_v16, %v141_v13 }
   0x9   :  { %v150_v17 = vcombine.high %v142_v15, %v142_v15  ;;  %v158_v19 = vrot.slane %v142_v15, %v141_v13  ;;  %v151_v21 = vcombine.high %v149_v18, %v149_v18  ;;  %v165_v26 = vrot.slane %v149_v18, %v141_v13 }
   0xa   :  { %376 = vmatmul.mubr.msk.bf16.vlgmr.msra.gmra.mrb[0].mxu0 %vm56_vm0, %v391_v4  ;;  %380 = vmatmul.mubr.msk.bf16.vlgmr.msra.gmra.mrb[0].mxu1 %vm56_vm0, %v393_v5 }
   0xb   :  { %v172_v20 = vrot.slane %v150_v17, %v141_v13  ;;  %v180_v22 = vcombine.high %v158_v19, %v158_v19  ;;  %v179_v25 = vrot.slane %v151_v21, %v141_v13  ;;  %v187_v28 = vrot.slane %v158_v19, %v186_v23 }
   0xc   :  { %v181_v34 = vcombine.high %v165_v26, %v165_v26  ;;  %v203_v35 = vrot.slane %v165_v26, %v186_v23 }
   0xd   :  { %v182_v24 = vcombine.high %v172_v20, %v172_v20  ;;  %v195_v27 = vrot.slane %v180_v22, %v186_v23  ;;  %v183_v30 = vcombine.high %v179_v25, %v179_v25  ;;  %v191_v32 = vrot.slane %v172_v20, %v186_v23 }
   0xe   :  { %v207_v42 = vrot.slane %v179_v25, %v186_v23  ;;  %v211_v48 = vrot.slane %v181_v34, %v186_v23 }
   0xf   :  { %v199_v29 = vrot.slane %v182_v24, %v186_v23  ;;  %v215_v45 = vrot.slane %v183_v30, %v186_v23 }
  0xdd   :  { %v377_v31 = vpop.f32.mrb[0].mxu0  ;;  %v381_v33 = vpop.f32.mrb[0].mxu1 }
  0xde   :  { %v226_v36 = vadd.f32 %v377_v31, %v195_v27  ;;  %v103_v37 = vpop.f32.mrb[1].mxu0  ;;  %v119_v38 = vpop.f32.mrb[1].mxu1  ;;  %v230_v52 = vadd.f32 %v381_v33, %v211_v48 }
  0xdf   :  { %v224_v39 = vadd.f32 %v187_v28, %v103_v37  ;;  %v378_v40 = vpop.f32.mrb[2].mxu0  ;;  %v382_v41 = vpop.f32.mrb[2].mxu1  ;;  %v228_v49 = vadd.f32 %v203_v35, %v119_v38 }
  0xe0   :  { %395 = vtanh.f32 %v226_v36  ;;  %v227_v43 = vadd.f32 %v378_v40, %v199_v29  ;;  %v106_v44 = vpop.f32.mrb[3].mxu0  ;;  %v122_v46 = vpop.f32.mrb[3].mxu1  ;;  %v231_v51 = vadd.f32 %v382_v41, %v215_v45 }
  0xe1   :  { %397 = vtanh.f32 %v224_v39  ;;  %v225_v47 = vadd.f32 %v191_v32, %v106_v44  ;;  %v229_v50 = vadd.f32 %v207_v42, %v122_v46 }
  0xe2   :  { %399 = vtanh.f32 %v227_v43 }
  0xe3   :  { %401 = vtanh.f32 %v225_v47 }
  0xe4   :  { %403 = vtanh.f32 %v228_v49 }
  0xe5   :  { %405 = vtanh.f32 %v229_v50 }
  0xe6   :  { %407 = vtanh.f32 %v231_v51 }
  0xe7   :  { %409 = vtanh.f32 %v230_v52 }
  0xea   :  { %v396_v54 = vpop.eup %395 }
  0xeb   :  { %v398_v55 = vpop.eup %397  ;;  %v248_v56 = vmul.f32 %v396_v54, %v364_v53 }
  0xec   :  { %v400_v57 = vpop.eup %399  ;;  %v246_v58 = vmul.f32 %v398_v55, %v364_v53 }
  0xed   :  { %v402_v59 = vpop.eup %401  ;;  %v260_v60 = vsel %vm56_vm0, %v248_v56, 0.0  ;;  %v249_v61 = vmul.f32 %v400_v57, %v364_v53 }
  0xee   :  { %261 = vadd.xlane.f32.xlu1 %v260_v60  ;;  %v254_v62 = vsel %vm56_vm0, %v246_v58, 0.0  ;;  %v247_v63 = vmul.f32 %v402_v59, %v364_v53  ;;  %v404_v0 = vpop.eup %403 }
  0xef   :  { %255 = vadd.xlane.f32.xlu0 %v254_v62  ;;  %v406_v1 = vpop.eup %405  ;;  %v263_v2 = vsel %vm56_vm0, %v249_v61, 0.0  ;;  %v250_v6 = vmul.f32 %v404_v0, %v364_v53 }
  0xf0   :  { %v408_v3 = vpop.eup %407  ;;  %v257_v4 = vsel %vm56_vm0, %v247_v63, 0.0  ;;  %v251_v5 = vmul.f32 %v406_v1, %v364_v53 }
  0xf1   :  { %v410_v7 = vpop.eup %409  ;;  %v253_v10 = vmul.f32 %v408_v3, %v364_v53  ;;  %v266_v11 = vsel %vm56_vm0, %v250_v6, 0.0 }
  0xf2   :  { %264 = vadd.xlane.f32.xlu1 %v263_v2  ;;  %v269_v8 = vsel %vm56_vm0, %v251_v5, 0.0  ;;  %v252_v12 = vmul.f32 %v410_v7, %v364_v53 }
  0xf3   :  { %258 = vadd.xlane.f32.xlu0 %v257_v4  ;;  %v275_v13 = vsel %vm56_vm0, %v253_v10, 0.0 }
  0xf4   :  { %v272_v14 = vsel %vm56_vm0, %v252_v12, 0.0 }
  0xf6   :  { %270 = vadd.xlane.f32.xlu1 %v269_v8 }
  0xf7   :  { %267 = vadd.xlane.f32.xlu0 %v266_v11 }
  0xfa   :  { %276 = vadd.xlane.f32.xlu1 %v275_v13 }
  0xfb   :  { %273 = vadd.xlane.f32.xlu0 %v272_v14 }
 0x17b   :  { %v262_v15 = vpop.xlane.xlu1 %261 }
 0x17c   :  { %v256_v16 = vpop.xlane.xlu0 %255  ;;  %v299_v21 = vrot.slane %v262_v15, %v463_v9 }
 0x17d   :  { %v291_v19 = vrot.slane %v256_v16, %v463_v9 }
 0x17f   :  { %v265_v17 = vpop.xlane.xlu1 %264 }
 0x180   :  { %v259_v18 = vpop.xlane.xlu0 %258  ;;  %v303_v22 = vrot.slane %v265_v17, %v463_v9 }
 0x181   :  { %v295_v20 = vrot.slane %v259_v18, %v463_v9 }
 0x183   :  { %v321_v23 = vsel %vm320_vm1, %v295_v20, %v291_v19  ;;  %v271_v24 = vpop.xlane.xlu1 %270 }
 0x184   :  { %v323_v25 = vsel %vm322_vm2, %v299_v21, %v321_v23  ;;  %v268_v26 = vpop.xlane.xlu0 %267  ;;  %v311_v31 = vrot.slane %v271_v24, %v463_v9 }
 0x185   :  { %v325_v27 = vsel %vm324_vm3, %v303_v22, %v323_v25  ;;  %v307_v28 = vrot.slane %v268_v26, %v463_v9 }
 0x187   :  { %v327_v29 = vsel %vm326_vm4, %v307_v28, %v325_v27  ;;  %v277_v30 = vpop.xlane.xlu1 %276 }
 0x188   :  { %v274_v32 = vpop.xlane.xlu0 %273  ;;  %v319_v34 = vrot.slane %v277_v30, %v463_v9  ;;  %v329_v35 = vsel %vm328_vm5, %v311_v31, %v327_v29 }
 0x189   :  { %v315_v33 = vrot.slane %v274_v32, %v463_v9 }
 0x18b   :  { %v331_v36 = vsel %vm330_vm6, %v315_v33, %v329_v35 }
 0x18c   :  { %v333_v37 = vsel %vm332_vm7, %v319_v34, %v331_v36 }
 0x18d   :  { %336 = vst.msk [vmem:[%s504_s4] sm:$0xff] %vm335_vm8, %v333_v37 }
 0x194   :  { %v337_v38 = vld [vmem:[%s504_s4] sm:$0xff] }
 0x195   :  { %v338_v39 = vsel %vm335_vm8, %v337_v38, -inf }
 0x196   :  { %339 = vmax.xlane.f32.xlu0 %v338_v39 }
 0x223   :  { %v340_v40 = vpop.xlane.xlu0 %339 }
 0x224   :  { %v341_v41 = vsub.f32 %v337_v38, %v340_v40 }
 0x226   :  { %v342_v42 = vmul.f32 1.442695, %v341_v41 }
 0x228   :  { %411 = vpow2.f32 %v342_v42 }
 0x232   :  { %v412_v9 = vpop.eup %411 }
 0x233   :  { %v344_v43 = vsel %vm335_vm8, %v412_v9, 0.0 }
 0x234   :  { %345 = vadd.xlane.f32.xlu1 %v344_v43 }
 0x2c1   :  { %v346_v44 = vpop.xlane.xlu1 %345 }
 0x2c2   :  { %413 = vrcp.f32 %v346_v44 }
 0x2cc   :  { %v414_v45 = vpop.eup %413 }
 0x2cd   :  { %v348_v46 = vmul.f32 %v414_v45, %v412_v9 }
 0x2cf   :  { %349 = vst.msk [vmem:[%s504_s4] sm:$0xff] %vm335_vm8, %v348_v46 }

</bundles_post_ra>
